<compile_context>
chip_gen: v5e
topology: v5e:2x2
jax: 0.10.0
libtpu: 0.0.40
codegen_flags: <defaults>
</compile_context>

<pallas_src>
import jax
import jax.numpy as jnp
from jax import lax
from jax.experimental import pallas as pl
from jax.experimental.pallas import tpu as pltpu


def _round_up(x, m):
    return (x + m - 1) // m * m


def _pick_tile_px(hw, n_batch):
    """Largest 128-multiple divisor of H*W (capped), >=2 tiles when N == 1."""
    divisors = [c for c in (1024, 512, 256, 128) if hw % c == 0]
    if not divisors:
        return hw                       # full-extent block (equals full dim)
    if n_batch == 1:
        for c in divisors:
            if hw // c >= 2:            # keep both v7x TensorCores busy
                return c
    return divisors[0]


def _aux_head_kernel(cols_ref, w1_ref, shift_ref, w2_ref, b2_ref, o_ref):
    # cols_ref : (9*Cin_p, tile_px) bf16  im2col pixel tile (channels-major)
    # w1_ref   : (Cmid, 9*Cin_p)    bf16  BN-scale-folded conv3x3 weights
    # shift_ref: (Cmid, 1)          f32   folded BN shift
    # w2_ref   : (K, Cmid)          bf16  conv1x1 weights
    # b2_ref   : (K, 1)             f32   conv1x1 bias
    # o_ref    : (K, tile_px)             output tile (real classes, pixels on lanes)
    acc = jnp.dot(w1_ref[...], cols_ref[...],
                  preferred_element_type=jnp.float32)          # (Cmid, tile_px)
    y = jnp.maximum(acc + shift_ref[...], 0.0)                  # BN shift + ReLU
    # TODO(synk): Dropout(p=0.1) is identity in eval mode; training-mode masking not implemented.
    out = jnp.dot(w2_ref[...], y.astype(jnp.bfloat16),
                  preferred_element_type=jnp.float32) + b2_ref[...]
    o_ref[...] = out.astype(o_ref.dtype)


def aux_head_forward(x_nchw, params, tile_px=None, out_dtype=jnp.float32):
    w1 = params["conv1_w"]            # (Cmid, Cin, 3, 3)  PyTorch OIHW
    gamma, beta = params["bn_gamma"], params["bn_beta"]
    mean, var = params["bn_mean"], params["bn_var"]
    eps = params["bn_eps"]
    w2 = params["conv2_w"]            # (K, Cmid, 1, 1)
    b2 = params["conv2_b"]            # (K,)

    N, Cin, H, W = x_nchw.shape
    Cmid = w1.shape[0]
    K = w2.shape[0]
    HW = H * W
    Ck = 9 * Cin
    Ck_p = _round_up(Ck, 8)           # sublane-aligned contraction dim

    if tile_px is None:
        tile_px = _pick_tile_px(HW, N)
    assert HW % tile_px == 0, "tile_px must divide H*W"
    assert tile_px % 128 == 0 or tile_px == HW, \
        "tile_px must be a multiple of 128 (or the full H*W extent)"
    n_tiles = HW // tile_px

    # --- wrapper-side im2col, channels-major: channel index = (ky*3+kx)*Cin + c
    xp = jnp.pad(x_nchw, ((0, 0), (0, 0), (1, 1), (1, 1)))      # (N,Cin,H+2,W+2)
    cols = jnp.concatenate(
        [xp[:, :, dy:dy + H, dx:dx + W] for dy in range(3) for dx in range(3)],
        axis=1)                                                 # (N, 9*Cin, H, W)
    cols = jnp.pad(cols, ((0, 0), (0, Ck_p - Ck), (0, 0), (0, 0)))
    cols = cols.reshape(N, Ck_p, HW).astype(jnp.bfloat16)       # bf16 in HBM

    # --- fold inference BatchNorm: scale into conv3x3 weights, keep shift ---
    scale = gamma / jnp.sqrt(var + eps)                         # (Cmid,)
    shift = beta - mean * scale                                 # (Cmid,)
    # OIHW -> (O, kh, kw, I) -> (Cmid, 9*Cin) matching the im2col channel order
    w1_cm = jnp.transpose(w1, (0, 2, 3, 1)).reshape(Cmid, Ck) * scale[:, None]
    w1_cm = jnp.pad(w1_cm, ((0, 0), (0, Ck_p - Ck))).astype(jnp.bfloat16)
    shift_cm = shift.reshape(Cmid, 1).astype(jnp.float32)
    w2_cm = w2[:, :, 0, 0].astype(jnp.bfloat16)                 # (K, Cmid)
    b2_cm = b2.reshape(K, 1).astype(jnp.float32)

    out_flat = pl.pallas_call(
        _aux_head_kernel,
        out_shape=jax.ShapeDtypeStruct((N, K, HW), out_dtype),
        grid_spec=pltpu.PrefetchScalarGridSpec(
            num_scalar_prefetch=0,
            grid=(N, n_tiles),
            in_specs=[
                pl.BlockSpec((None, Ck_p, tile_px), lambda b, t: (b, 0, t)),
                pl.BlockSpec((Cmid, Ck_p), lambda b, t: (0, 0)),
                pl.BlockSpec((Cmid, 1), lambda b, t: (0, 0)),
                pl.BlockSpec((K, Cmid), lambda b, t: (0, 0)),
                pl.BlockSpec((K, 1), lambda b, t: (0, 0)),
            ],
            out_specs=pl.BlockSpec((None, K, tile_px), lambda b, t: (b, 0, t)),
        ),
        compiler_params=pltpu.CompilerParams(
            dimension_semantics=("parallel", "parallel"),
            vmem_limit_bytes=32 * 1024 * 1024),
    )(cols, w1_cm, shift_cm, w2_cm, b2_cm)

    # (N, K, H*W) is already channels-major: NCHW comes out of a free reshape.
    return out_flat.reshape(N, K, H, W)


def _reference(x_nchw, params, match_kernel_precision=False):
    """Pure-JAX reference. With match_kernel_precision=True it rounds the
    matmul operands to bf16 exactly like the kernel does (f32 accumulation)."""
    scale = params["bn_gamma"] / jnp.sqrt(params["bn_var"] + params["bn_eps"])
    shift = params["bn_beta"] - params["bn_mean"] * scale
    w1 = params["conv1_w"] * scale[:, None, None, None]   # fold BN scale
    w2 = params["conv2_w"]
    x = x_nchw
    if match_kernel_precision:
        rnd = lambda a: a.astype(jnp.bfloat16).astype(jnp.float32)
        x, w1, w2 = rnd(x), rnd(w1), rnd(w2)
    y = lax.conv_general_dilated(
        x, w1, window_strides=(1, 1), padding=((1, 1), (1, 1)),
        dimension_numbers=("NCHW", "OIHW", "NCHW"))
    y = y + shift[None, :, None, None]
    y = jnp.maximum(y, 0.0)
    if match_kernel_precision:
        y = y.astype(jnp.bfloat16).astype(jnp.float32)
    y = lax.conv_general_dilated(
        y, w2, window_strides=(1, 1), padding=((0, 0), (0, 0)),
        dimension_numbers=("NCHW", "OIHW", "NCHW"))
    return y + params["conv2_b"][None, :, None, None]


if __name__ == "__main__":
    N, Cin, H, W = 2, 4, 16, 16      # small shapes consistent with the module
    Cmid, K = 32, 8                  # mid_channels, num_classes

    key = jax.random.PRNGKey(0)
    ks = jax.random.split(key, 8)
    x = jax.random.normal(ks[0], (N, Cin, H, W), jnp.float32)

    params = {
        "conv1_w": jax.random.normal(ks[1], (Cmid, Cin, 3, 3), jnp.float32) * 0.1,
        "bn_gamma": jax.random.uniform(ks[2], (Cmid,), jnp.float32, 0.5, 1.5),
        "bn_beta": jax.random.normal(ks[3], (Cmid,), jnp.float32) * 0.1,
        "bn_mean": jax.random.normal(ks[4], (Cmid,), jnp.float32) * 0.1,
        "bn_var": jax.random.uniform(ks[5], (Cmid,), jnp.float32, 0.5, 1.5),
        "bn_eps": 1e-5,
        "conv2_w": jax.random.normal(ks[6], (K, Cmid, 1, 1), jnp.float32) * 0.1,
        "conv2_b": jax.random.normal(ks[7], (K,), jnp.float32) * 0.1,
    }

    # tile_px=128 exercises the (N, H*W//tile_px) grid (2 pixel tiles per image).
    out = jax.block_until_ready(aux_head_forward(x, params, tile_px=128))
    assert out.shape == (N, K, H, W)

    ref_bf16 = jax.block_until_ready(_reference(x, params, match_kernel_precision=True))
    ref_f32 = jax.block_until_ready(_reference(x, params, match_kernel_precision=False))
    # strict: kernel vs precision-matched reference (same bf16 operand rounding)
    assert float(jnp.max(jnp.abs(out - ref_bf16))) < 5e-3
    # sanity: kernel vs full-f32 reference (bf16 matmul inputs, f32 accumulate)
    assert float(jnp.max(jnp.abs(out - ref_f32))) < 5e-2
    print("KERNEL_OK")
</pallas_src>

<mosaic_0001>
module attributes {stable_mosaic.version = 11 : i64} {
  func.func @_aux_head_kernel(%arg0: i32, %arg1: i32, %arg2: memref<1x40x128xbf16, #tpu.memory_space<vmem>>, %arg3: memref<32x40xbf16, #tpu.memory_space<vmem>>, %arg4: memref<32x1xf32, #tpu.memory_space<vmem>>, %arg5: memref<8x32xbf16, #tpu.memory_space<vmem>>, %arg6: memref<8x1xf32, #tpu.memory_space<vmem>>, %arg7: memref<1x8x128xf32, #tpu.memory_space<vmem>>) attributes {dimension_semantics = [#tpu.dimension_semantics<parallel>, #tpu.dimension_semantics<parallel>], iteration_bounds = array<i64: 2, 2>, scalar_prefetch = 0 : i64, scratch_operands = 0 : i64, tpu.core_type = #tpu.core_type<tc>, window_params = [{transform_indices = @transform_0, window_bounds = array<i64: 1, 40, 128>}, {pipeline_mode = #tpu.pipeline_mode<synchronous>, transform_indices = @transform_1, window_bounds = array<i64: 32, 40>}, {pipeline_mode = #tpu.pipeline_mode<synchronous>, transform_indices = @transform_2, window_bounds = array<i64: 32, 1>}, {pipeline_mode = #tpu.pipeline_mode<synchronous>, transform_indices = @transform_3, window_bounds = array<i64: 8, 32>}, {pipeline_mode = #tpu.pipeline_mode<synchronous>, transform_indices = @transform_4, window_bounds = array<i64: 8, 1>}, {transform_indices = @transform_5, window_bounds = array<i64: 1, 8, 128>}]} {
    %c0 = arith.constant 0 : index
    %c0_0 = arith.constant 0 : index
    %0 = vector.load %arg3[%c0, %c0_0] : memref<32x40xbf16, #tpu.memory_space<vmem>>, vector<32x40xbf16>
    %c0_1 = arith.constant 0 : index
    %c0_2 = arith.constant 0 : index
    %c0_3 = arith.constant 0 : index
    %1 = vector.load %arg2[%c0_1, %c0_2, %c0_3] : memref<1x40x128xbf16, #tpu.memory_space<vmem>>, vector<1x40x128xbf16>
    %2 = vector.shape_cast %1 : vector<1x40x128xbf16> to vector<40x128xbf16>
    %cst = arith.constant dense<0.000000e+00> : vector<32x128xf32>
    %3 = tpu.matmul %0, %2, %cst {dimension_numbers = #tpu.dot_dimension_numbers<[1], [0], [0], [1], [0, 0, 1, 1], [], []>} : vector<32x40xbf16>, vector<40x128xbf16>, vector<32x128xf32> -> vector<32x128xf32>
    %c0_4 = arith.constant 0 : index
    %c0_5 = arith.constant 0 : index
    %4 = vector.load %arg4[%c0_4, %c0_5] : memref<32x1xf32, #tpu.memory_space<vmem>>, vector<32x1xf32>
    %5 = vector.broadcast %4 : vector<32x1xf32> to vector<32x128xf32>
    %6 = arith.addf %3, %5 : vector<32x128xf32>
    %cst_6 = arith.constant 0.000000e+00 : f32
    %7 = vector.broadcast %cst_6 : f32 to vector<32x128xf32>
    %8 = arith.maximumf %6, %7 : vector<32x128xf32>
    %c0_7 = arith.constant 0 : index
    %c0_8 = arith.constant 0 : index
    %9 = vector.load %arg5[%c0_7, %c0_8] : memref<8x32xbf16, #tpu.memory_space<vmem>>, vector<8x32xbf16>
    %10 = arith.truncf %8 : vector<32x128xf32> to vector<32x128xbf16>
    %cst_9 = arith.constant dense<0.000000e+00> : vector<8x128xf32>
    %11 = tpu.matmul %9, %10, %cst_9 {dimension_numbers = #tpu.dot_dimension_numbers<[1], [0], [0], [1], [0, 0, 1, 1], [], []>} : vector<8x32xbf16>, vector<32x128xbf16>, vector<8x128xf32> -> vector<8x128xf32>
    %c0_10 = arith.constant 0 : index
    %c0_11 = arith.constant 0 : index
    %12 = vector.load %arg6[%c0_10, %c0_11] : memref<8x1xf32, #tpu.memory_space<vmem>>, vector<8x1xf32>
    %13 = vector.broadcast %12 : vector<8x1xf32> to vector<8x128xf32>
    %14 = arith.addf %11, %13 : vector<8x128xf32>
    %c0_12 = arith.constant 0 : index
    %c0_13 = arith.constant 0 : index
    %c0_14 = arith.constant 0 : index
    %15 = vector.load %arg7[%c0_12, %c0_13, %c0_14] : memref<1x8x128xf32, #tpu.memory_space<vmem>>, vector<1x8x128xf32>
    %16 = vector.shape_cast %15 : vector<1x8x128xf32> to vector<8x128xf32>
    %17 = vector.shape_cast %14 : vector<8x128xf32> to vector<1x8x128xf32>
    tpu.vector_store %arg7[%c0_12, %c0_13, %c0_14], %17 {strides = array<i32>} : memref<1x8x128xf32, #tpu.memory_space<vmem>>, vector<1x8x128xf32>,
    return
  }
  func.func @transform_0(%arg0: i32, %arg1: i32) -> (i32, i32, i32) {
    %c0_i32 = arith.constant 0 : i32
    %c0_i32_0 = arith.constant 0 : i32
    return %arg0, %c0_i32, %arg1 : i32, i32, i32
  }
  func.func @transform_1(%arg0: i32, %arg1: i32) -> (i32, i32) {
    %c0_i32 = arith.constant 0 : i32
    %c0_i32_0 = arith.constant 0 : i32
    %c0_i32_1 = arith.constant 0 : i32
    return %c0_i32, %c0_i32_0 : i32, i32
  }
  func.func @transform_2(%arg0: i32, %arg1: i32) -> (i32, i32) {
    %c0_i32 = arith.constant 0 : i32
    %c0_i32_0 = arith.constant 0 : i32
    %c0_i32_1 = arith.constant 0 : i32
    return %c0_i32, %c0_i32_0 : i32, i32
  }
  func.func @transform_3(%arg0: i32, %arg1: i32) -> (i32, i32) {
    %c0_i32 = arith.constant 0 : i32
    %c0_i32_0 = arith.constant 0 : i32
    %c0_i32_1 = arith.constant 0 : i32
    return %c0_i32, %c0_i32_0 : i32, i32
  }
  func.func @transform_4(%arg0: i32, %arg1: i32) -> (i32, i32) {
    %c0_i32 = arith.constant 0 : i32
    %c0_i32_0 = arith.constant 0 : i32
    %c0_i32_1 = arith.constant 0 : i32
    return %c0_i32, %c0_i32_0 : i32, i32
  }
  func.func @transform_5(%arg0: i32, %arg1: i32) -> (i32, i32, i32) {
    %c0_i32 = arith.constant 0 : i32
    %c0_i32_0 = arith.constant 0 : i32
    return %arg0, %c0_i32, %arg1 : i32, i32, i32
  }
}

</mosaic_0001>

<bundles_post_ra>
// kernel: tpu_custom_call.1
= control target key start
LH: loop header
LB: loop body
LE: loop exit
PB: predicated region body
PF: predicated region fallthrough
CT: control target
= control target key end

     0   :  { %10 = vsyncpa [#allocation3], 0  ;;  %s942_s0 = inlined_call_operand.hbm [shape: bf16[2,40,256], index: 0, kind: input, shape index: {}]   ;;  %s943_s1 = inlined_call_operand.vmem [shape: bf16[32,40], index: 1, kind: input, shape index: {}]   ;;  %s944_s2 = inlined_call_operand.vmem [shape: f32[32,1], index: 2, kind: input, shape index: {}]   ;;  %s945_s3 = inlined_call_operand.vmem [shape: bf16[8,32], index: 3, kind: input, shape index: {}]   ;;  %s946_s4 = inlined_call_operand.vmem [shape: f32[8,1], index: 4, kind: input, shape index: {}]   ;;  %s947_s5 = inlined_call_operand.hbm [shape: f32[2,8,256], index: 5, kind: output, shape index: {}]  }
   0x1   :  { %12 = vsyncpa [#allocation3 + $0x1], 0 }
   0x2   :  { %13 = vsyncpa [#allocation4], 0 }
   0x3   :  { %15 = vsyncpa [#allocation4 + $0x1], 0  ;;  %s775_s18 = smov 0   ;;  %s777_s19 = smov 0  }
   0x4   :  { %s779_s20 = smov 0   ;;  %s781_s21 = smov 0  }
   0x5   :  { %s783_s22 = smov 0   ;;  %s785_s23 = smov 0  }
   0x6   :  { %s787_s24 = smov 0   ;;  %s789_s25 = smov 0  }
   0x7 LB: > { %952 = sst [smem:[#allocation8_spill]] %s719_s20  ;;  %s485_s26 = sadd.s32 4294967295, %s739_s25   ;;  %s739_s25 = sphi %s789_s25, %s21_s25   ;;  %s735_s24 = sphi %s787_s24, %s971_s24   ;;  %s731_s23 = sphi %s785_s23, %s970_s23   ;;  %s727_s22 = sphi %s783_s22, %s969_s22   ;;  %s723_s21 = sphi %s781_s21, %s968_s21   ;;  %s719_s20 = sphi %s779_s20, %s963_s20   ;;  %s715_s19 = sphi %s777_s19, %s967_s19   ;;  %s711_s18 = sphi %s775_s18, %s966_s18  }
   0x8   : > { %s486_s27 = sadd.s32 4294967294, %s739_s25   ;;  %s30_s28 = sadd.s32 1, %s731_s23 }
   0x9   : > { %s33_s29 = sadd.s32 1, %s735_s24  ;;  %p31_p0 = scmp.ge.s32.totalorder %s30_s28, 2 }
   0xa   : > { %s42_s30 = sadd.s32 1, %s719_s20  ;;  %p49_p1 = scmp.ne.s32.totalorder %s719_s20, %s715_s19 }
   0xb   : > { %p50_p2 = scmp.eq.s32.totalorder %s739_s25, 0  ;;  %s973_s28 = smov (%p31_p0, %s30_s28), 0 }
   0xc   : > { %953 = sst [smem:[#allocation9_spill]] %s973_s28  ;;  %s975_s29 = smov (!%p31_p0, %s33_s29), %s735_s24 }
   0xd   : > { %s38_s6 = ssub.s32 %s731_s23, %s973_s28  ;;  %p828_p3 = por %p50_p2, %p49_p1 }
   0xe   : > { %p35_p4 = scmp.ge.s32.totalorder %s975_s29, 2  ;;  %p55_p5 = scmp.ne.s32.totalorder %s715_s19, %s711_s18 }
   0xf   : > { %p56_p6 = scmp.eq.s32.totalorder %s485_s26, 0  ;;  %p165_p7 = scmp.eq.s32.totalorder %s485_s26, 3 }
  0x10   : > { %s977_s29 = smov (%p35_p4, %s975_s29), 0  ;;  %p171_p10 = scmp.eq.s32.totalorder %s486_s27, 3 }
  0x11   : > { %955 = sst [smem:[#allocation10_spill]] %s977_s29  ;;  %p836_p8 = por %p56_p6, %p55_p5 }
  0x12   : > { %p840_p9 = por %p165_p7, %p49_p1  ;;  %s37_s10 = ssub.s32 %s735_s24, %s977_s29 }
  0x13   : > { %s39_s11 = sor.u32 %s38_s6, %s37_s10  ;;  %p846_p12 = por %p171_p10, %p55_p5 }
  0x14   : > { %p40_p11 = scmp.eq.s32.totalorder %s39_s11, 0  ;;  %p538_p13 = scmp.lt.s32.totalorder %s739_s25, 4 }
  0x15   : > { %s958_s12 = scalar_select %p846_p12, 1, 0 }
  0x16   : > { %s203_s13 = sand.u32 1, %s719_s20   ;;  %s524_s16 = smul.u32 10, %s735_s24 }
  0x17   : > { %959 = sst [smem:[#allocation11_spill]] %s958_s12  ;;  %s523_s15 = smul.u32 20, %s203_s13 }
  0x18   : > { %s853_s14 = scalar_select %p40_p11, %s719_s20, %s42_s30  }
  0x19   : > { %p531_p0 = pnand %p538_p13, %p828_p3  ;;  %s211_s17 = sadd.s32 %s731_s23, %s524_s16 }
  0x1a   : > { %960 = sst [smem:[#allocation12_spill]] %s853_s14  ;;  %s207_s26 = scalar_lea.vmem [#allocation2], %s523_s15 }
  0x1b   : > { %s216_s29 = sshll.u32 %s207_s26, 4  ;;  %s489_s27 = sshll.u32 %s211_s17, 2  ;;  %s217_s29 = int_to_ptr.vmem [resolvable:$true] %s216_s29 }
  0x1c   : > { %s213_s11 = scalar_lea.hbm %s942_s0, %s489_s27  ;;  %s204_s12 = scalar_lea.sflag [#allocation3], %s203_s13 }
  0x1d   : > { %s214_s28 = sshll.u32 %s213_s11, 4  ;;  %s741_s30 = smov 128   ;;  %s215_s28 = int_to_ptr.hbm [resolvable:$true] %s214_s28 }
  0x1e   : > { %s742_s14 = smov 64   ;;  %s743_s20 = smov 4  }
  0x1f   : > { %533 = dma.hbm_to_vmem [thread:$0]  (!%p531_p0), %s215_s28, 320, %s217_s29, %s204_s12, %s741_s30, %s742_s14, %s743_s20  }
  0x20   : > { %p490_p1 = scmp.ge.s32.totalorder %s739_s25, 1  ;;  %p224_p2 = scmp.lt.s32.totalorder %s739_s25, 5 }
  0x22   : > { %p225_p4 = pnand %p490_p1, %p224_p2 }
  0x23   : > { %s865_s7 = sand.u32 (!%p225_p4), 1, %s715_s19  }
  0x24   : > { %228 = sbr.rel (%p225_p4) target bundleno = 346 (0x15a), region = 40  ;;  %s231_s16 = scalar_lea.sflag (!%p225_p4), [#allocation3], %s865_s7 }
  0x25   : > { %s525_s15 = smul.u32 (!%p225_p4), 20, %s865_s7 }
  0x27   : > { %s234_s17 = scalar_lea.vmem (!%p225_p4), [#allocation2], %s525_s15 }
  0x29   : > { %702 = dma.done.wait (%p836_p8), %s231_s16, 320  }
  0x2a   : > { %704 = vsyncadd (%p836_p8), %s231_s16, 4294966976  ;;  %v744_v0 = vmov 0   ;;  %v271_v1 = vld [vmem:[%s234_s17 + $0x10] sm:$0xf]  ;;  %vm328_vm0 = vcmask 1043456   ;;  %v519_v7 = vld [vmem:[%s234_s17 + $0x8] sm:$0xff] }
  0x2b   : > { %608 = vset.pattern.permute.xlu0 %v744_v0  ;;  %609 = vset.pattern.permute.xlu1 %v744_v0  ;;  %v315_v2 = vunpack.c.l.b16 %v271_v1  ;;  %v274_v3 = vld [vmem:[%s944_s2 + $0x10] sm:$0xff]  ;;  %v272_v4 = vld [vmem:[%s944_s2] sm:$0xff]  ;;  %v275_v8 = vld [vmem:[%s944_s2 + $0x18] sm:$0xff]  ;;  %vm321_vm1 = vcmask 326656   ;;  %vm364_vm2 = vcmask 261120   ;;  %s512_s20 = sshll.u32 %s727_s22, 1 }
  0x2c   : > { %610 = vset.pattern.permute.xlu2 %v744_v0  ;;  %288 = vperm.xlu0 %608, %v274_v3   ;;  %v273_v9 = vld [vmem:[%s944_s2 + $0x8] sm:$0xff]  ;;  %v518_v10 = vld [vmem:[%s234_s17] sm:$0xff]  ;;  %s393_s28 = sadd.s32 %s723_s21, %s512_s20  ;;  %s491_s12 = sshll.u32 %s865_s7, 3 }
  0x2d   : > { %v318_v5 = vpack.c.b16 %v315_v2, %v315_v2  ;;  %278 = vperm.xlu1 %609, %v272_v4   ;;  %v517_v11 = vld [vmem:[%s943_s1 + $0x8] sm:$0xff]  ;;  %v516_v12 = vld [vmem:[%s943_s1] sm:$0xff]  ;;  %s513_s29 = sshll.u32 %s393_s28, 3  ;;  %s261_s26 = scalar_lea.vmem [#allocation5], %s491_s12 }
  0x2e   : > { %v358_v13 = vld [vmem:[%s946_s4] sm:$0xff]  ;;  %s395_s14 = scalar_lea.hbm %s947_s5, %s513_s29  ;;  %s397_s27 = sshll.u32 %s261_s26, 4  ;;  %s398_s27 = int_to_ptr.vmem [resolvable:$true] %s397_s27 }
  0x2f   : > { %v330_v6 = vsel %vm328_vm0, %v318_v5, 0  ;;  %361 = vperm.xlu2 %610, %v358_v13   ;;  %v355_v32 = vld [vmem:[%s945_s3] sm:$0xf]  ;;  %s399_s6 = sshll.u32 %s395_s14, 4  ;;  %s383_s10 = scalar_lea.sflag [#allocation4], %s865_s7  ;;  %s400_s6 = int_to_ptr.hbm [resolvable:$true] %s399_s6 }
  0x30   : > { %520 = vmatpush.bf16.msra.mxu2 %v330_v6  ;;  %337 = vmatpush.bf16.msra.mxu0 %v330_v6  ;;  %s655_s11 = sshra.s32 %s400_s6, 4  ;;  %s661_s15 = scalar_lea.hbm %s947_s5, 32  ;;  %s656_s11 = int_to_ptr.hbm [resolvable:$true] %s655_s11 }
  0x31   : > { %s657_s21 = scalar_lea.hbm %s656_s11, 8  ;;  %p662_p7 = scmp.lt.s32.totalorder %s656_s11, %s947_s5 }
  0x32   : > { %p658_p3 = scmp.ne.s32.totalorder %s656_s11, %s657_s21  ;;  %p663_p8 = scmp.lt.s32.totalorder %s661_s15, %s657_s21 }
  0x34   : > { %521 = vmatpush.bf16.msra.mxu2 %v519_v7  ;;  %338 = vmatpush.bf16.msra.mxu0 %v519_v7  ;;  %p659_p5 = pnand %p658_p3, %p840_p9  ;;  %p664_p10 = por %p663_p8, %p662_p7 }
  0x35   : > { %293 = vperm.xlu0 %608, %v275_v8   ;;  %283 = vperm.xlu1 %609, %v273_v9  }
  0x36   : > { %p660_p6 = pneg %p659_p5 }
  0x38   : > { %522 = vmatpush.bf16.msra.mxu2 %v518_v10  ;;  %339 = vmatpush.bf16.msra.mxu0 %v518_v10  ;;  %p665_p11 = pnand %p664_p10, %p660_p6 }
  0x3b   : > { %509 = vmatmul.msk.bf16.vlgmr.msra.gmra.mxu2 %vm321_vm1, %v517_v11  ;;  %508 = vmatmul.msk.bf16.vlgmr.msra.gmra.mxu0 %vm321_vm1, %v516_v12 }
  0x89   : > { %v362_v33 = vpop.permute.xlu2 %361 }
  0x9e   : > { %v289_v16 = vpop.permute.xlu0 %288 }
  0x9f   : > { %v279_v14 = vpop.permute.xlu1 %278 }
  0xa7   : > { %v284_v18 = vpop.permute.xlu1 %283  ;;  %v294_v21 = vpop.permute.xlu0 %293 }
  0xb8   : > { %v341_v15 = vpop.f32.mrf.mxu0 }
  0xb9   : > { %v342_v23 = vadd.f32 %v341_v15, %v279_v14 }
  0xbb   : > { %v351_v28 = vmax.f32 %v342_v23, 0.0 }
  0xbe   : > { %v346_v17 = vpop.f32.mrf.mxu2 }
  0xbf   : > { %v347_v20 = vadd.f32 %v346_v17, %v289_v16 }
  0xc0   : > { %v343_v19 = vpop.f32.mrf.mxu0 }
  0xc1   : > { %v344_v24 = vadd.f32 %v343_v19, %v284_v18  ;;  %v353_v26 = vmax.f32 %v347_v20, 0.0 }
  0xc3   : > { %v352_v29 = vmax.f32 %v344_v24, 0.0 }
  0xc5   : > { %v356_v31 = vpack.c.bf16 %v352_v29, %v351_v28 }
  0xc6   : > { %v348_v22 = vpop.f32.mrf.mxu2 }
  0xc7   : > { %v349_v25 = vadd.f32 %v348_v22, %v294_v21 }
  0xc9   : > { %v354_v27 = vmax.f32 %v349_v25, 0.0 }
  0xcb   : > { %v357_v30 = vpack.c.bf16 %v354_v27, %v353_v26 }
  0xcd   : > { %374 = vmatpush.bf16.msra.mxu1 %v357_v30 }
  0xd1   : > { %375 = vmatpush.bf16.msra.mxu1 %v356_v31 }
  0xd4   : > { %510 = vmatmul.msk.bf16.vlgmr.msra.gmra.mxu1 %vm364_vm2, %v355_v32 }
 0x151   : > { %v377_v34 = vpop.f32.mrf.mxu1 }
 0x152   : > { %v378_v35 = vadd.f32 %v377_v34, %v362_v33 }
 0x154   : > { %381 = vst [vmem:[%s261_s26] sm:$0xff] %v378_v35 }
 0x155   : > { %668 = shalt.err (!%p665_p11)
}
 0x156   : > { %528 = dma.vmem_to_hbm [thread:$0]  (%p840_p9), %s398_s27, 128, %s400_s6, %s383_s10  }
 0x159   : > { %v379_v36 = vpop.f32.mrf.mxu1 }
 0x15a PF: > { %p539_p13 = scmp.ge.s32.totalorder %s739_s25, 2  ;;  %s411_s20 = sand.u32 1, %s711_s18  }
 0x15b   : > { %s412_s28 = scalar_lea.sflag [#allocation4], %s411_s20 }
 0x15c   : > { %p535_p0 = pnand %p539_p13, %p846_p12 }
 0x15e   : > { %p536_p1 = pneg %p535_p0 }
 0x160   : > { %706 = dma.done.wait (%p536_p1), %s412_s28, 128  }
 0x161   : > { %708 = vsyncadd (%p536_p1), %s412_s28, 4294967168  ;;  %s21_s25 = sadd.s32 1, %s739_s25   ;;  %s962_s29 = sld [smem:[#allocation8_spill]] }
 0x162   : > { %p18_p2 = scmp.ge.s32.totalorder %s21_s25, 6   ;;  %s963_s20 = sld [smem:[#allocation12_spill]] }
 0x163   : > { %s964_s9 = sld [smem:[#allocation9_spill]]  ;;  %s966_s18 = smov %s715_s19 }
 0x164   : > { %s965_s12 = sld [smem:[#allocation10_spill]]  ;;  %s968_s21 = smov %s731_s23 }
 0x165   : > { %s969_s22 = smov %s735_s24 }
 0x166   :  { %20 = sbr.rel (!%p18_p2) target bundleno = 7 (0x7), region = 85 }
 0x167   : > { %s967_s19 = smov %s962_s29 }
 0x169   : > { %s970_s23 = smov %s964_s9 }
 0x16a   : > { %s971_s24 = smov %s965_s12 }
 0x16b   :  { %418 = vsyncpa [#allocation3], 1 }
 0x16c   :  { %420 = vsyncpa [#allocation3 + $0x1], 1 }
 0x16d   :  { %421 = vsyncpa [#allocation4], 1 }
 0x16e   :  { %423 = vsyncpa [#allocation4 + $0x1], 1 }

</bundles_post_ra>
